<compile_context>
chip_gen: v7x
topology: tpu7x:2x2x1
jax: 0.10.0
libtpu: 0.0.40
codegen_flags: <defaults>
</compile_context>

<pallas_src>
import jax
import jax.numpy as jnp
from jax.experimental import pallas as pl
from jax.experimental.pallas import tpu as pltpu


def _round_up(n, m):
    return ((n + m - 1) // m) * m


def autoencoder_kernel(x_ref,
                       w1_ref, b1_ref,
                       w2_ref, b2_ref,
                       w3_ref, b3_ref,
                       w4_ref, b4_ref,
                       o_ref):
    """Feature-major fused forward.  x_ref: (2, TB); o_ref: (2, TB).
    Weights: (out, in); biases: (out, 1). All math in f32 on the VPU."""
    x = x_ref[...]  # (2, TB) f32

    def dense(w_ref, b_ref, a, relu=False):
        # y = W @ a + b, computed as unrolled broadcast FMAs (no MXU).
        out_dim, in_dim = w_ref.shape
        acc = w_ref[:, 0:1] * a[0:1, :]                 # (out, TB)
        for i in range(1, in_dim):
            acc = acc + w_ref[:, i:i + 1] * a[i:i + 1, :]
        acc = acc + b_ref[...]                          # (out, 1) broadcast over lanes
        if relu:
            acc = jnp.maximum(acc, 0.0)
        return acc

    # encoder: Linear(2,10) -> ReLU -> Linear(10,5)
    h1 = dense(w1_ref, b1_ref, x, relu=True)            # (10, TB)
    z = dense(w2_ref, b2_ref, h1)                       # (5, TB)
    # decoder: Linear(5,10) -> ReLU -> Linear(10,2)
    h2 = dense(w3_ref, b3_ref, z, relu=True)            # (10, TB)
    y = dense(w4_ref, b4_ref, h2)                       # (2, TB)

    o_ref[...] = y.astype(o_ref.dtype)


def autoencoder_forward(x, params, *, block_b=1024):
    """x: (B, 2) float32 (PyTorch layout).  params: w{i} as (out,in), b{i} as (out,1).
    Returns (B, 2) float32."""
    B, F = x.shape
    assert F == 2

    w1, b1 = params["w1"], params["b1"]
    w2, b2 = params["w2"], params["b2"]
    w3, b3 = params["w3"], params["b3"]
    w4, b4 = params["w4"], params["b4"]

    # --- layout plumbing: feature-major, lane-dense batch axis, pad B ---
    if B > block_b:
        TB = block_b
    else:
        TB = _round_up(B, 128)
    Bp = _round_up(B, TB)

    x_fb = x.T                                          # (2, B)
    if Bp != B:
        x_fb = jnp.pad(x_fb, ((0, 0), (0, Bp - B)))

    grid = (Bp // TB,)

    tile_spec = pl.BlockSpec((2, TB), lambda i: (0, i))            # x / out: tiled over B
    resident = lambda a: pl.BlockSpec(a.shape, lambda i: (0, 0))   # weights: VMEM-resident

    out_fb = pl.pallas_call(
        autoencoder_kernel,
        out_shape=jax.ShapeDtypeStruct((2, Bp), x.dtype),
        grid_spec=pltpu.PrefetchScalarGridSpec(
            num_scalar_prefetch=0,
            grid=grid,
            in_specs=[tile_spec,
                      resident(w1), resident(b1),
                      resident(w2), resident(b2),
                      resident(w3), resident(b3),
                      resident(w4), resident(b4)],
            out_specs=tile_spec,
        ),
        compiler_params=pltpu.CompilerParams(
            dimension_semantics=("parallel",),
        ),
    )(x_fb, w1, b1, w2, b2, w3, b3, w4, b4)

    return out_fb[:, :B].T                              # back to (B, 2)


def init_params(key):
    """nn.Linear-style U(-1/sqrt(fan_in), 1/sqrt(fan_in)) init.
    Weights stored as (out, in) (PyTorch convention), biases as (out, 1)."""
    dims = [(2, 10), (10, 5), (5, 10), (10, 2)]  # (fan_in, fan_out) per layer
    params = {}
    keys = jax.random.split(key, 2 * len(dims))
    for i, (fan_in, fan_out) in enumerate(dims):
        bound = 1.0 / (fan_in ** 0.5)
        w = jax.random.uniform(keys[2 * i], (fan_out, fan_in),
                               minval=-bound, maxval=bound, dtype=jnp.float32)
        b = jax.random.uniform(keys[2 * i + 1], (fan_out, 1),
                               minval=-bound, maxval=bound, dtype=jnp.float32)
        params[f"w{i + 1}"] = w
        params[f"b{i + 1}"] = b
    return params


def reference_forward(x, p):
    """Pure-JAX reference in PyTorch (B, F) layout."""
    h = jnp.maximum(x @ p["w1"].T + p["b1"].T, 0.0)
    z = h @ p["w2"].T + p["b2"].T
    h2 = jnp.maximum(z @ p["w3"].T + p["b3"].T, 0.0)
    return h2 @ p["w4"].T + p["b4"].T


if __name__ == "__main__":
    key = jax.random.PRNGKey(0)
    k_param, k_x, k_x2 = jax.random.split(key, 3)

    params = init_params(k_param)

    # Small primary check (single grid step): batch=8, features=2.
    x = jax.random.normal(k_x, (8, 2), dtype=jnp.float32)
    out = autoencoder_forward(x, params)
    out = jax.block_until_ready(out)
    ref = reference_forward(x, params)
    assert out.shape == (8, 2)
    assert jnp.allclose(out, ref, atol=1e-5, rtol=1e-5)

    # Secondary check exercising the multi-tile pipelined path + batch padding.
    x2 = jax.random.normal(k_x2, (640, 2), dtype=jnp.float32)
    out2 = jax.block_until_ready(autoencoder_forward(x2, params, block_b=256))
    ref2 = reference_forward(x2, params)
    assert out2.shape == (640, 2)
    assert jnp.allclose(out2, ref2, atol=1e-5, rtol=1e-5)

    print("KERNEL_OK")
</pallas_src>

<mosaic_0001>
module attributes {stable_mosaic.version = 11 : i64} {
  func.func @autoencoder_kernel(%arg0: i32, %arg1: memref<2x128xf32, #tpu.memory_space<vmem>>, %arg2: memref<10x2xf32, #tpu.memory_space<vmem>>, %arg3: memref<10x1xf32, #tpu.memory_space<vmem>>, %arg4: memref<5x10xf32, #tpu.memory_space<vmem>>, %arg5: memref<5x1xf32, #tpu.memory_space<vmem>>, %arg6: memref<10x5xf32, #tpu.memory_space<vmem>>, %arg7: memref<10x1xf32, #tpu.memory_space<vmem>>, %arg8: memref<2x10xf32, #tpu.memory_space<vmem>>, %arg9: memref<2x1xf32, #tpu.memory_space<vmem>>, %arg10: memref<2x128xf32, #tpu.memory_space<vmem>>) attributes {dimension_semantics = [#tpu.dimension_semantics<parallel>], iteration_bounds = array<i64: 1>, scalar_prefetch = 0 : i64, scratch_operands = 0 : i64, tpu.core_type = #tpu.core_type<tc>, window_params = [{transform_indices = @transform_0, window_bounds = array<i64: 2, 128>}, {pipeline_mode = #tpu.pipeline_mode<synchronous>, transform_indices = @transform_1, window_bounds = array<i64: 10, 2>}, {pipeline_mode = #tpu.pipeline_mode<synchronous>, transform_indices = @transform_2, window_bounds = array<i64: 10, 1>}, {pipeline_mode = #tpu.pipeline_mode<synchronous>, transform_indices = @transform_3, window_bounds = array<i64: 5, 10>}, {pipeline_mode = #tpu.pipeline_mode<synchronous>, transform_indices = @transform_4, window_bounds = array<i64: 5, 1>}, {pipeline_mode = #tpu.pipeline_mode<synchronous>, transform_indices = @transform_5, window_bounds = array<i64: 10, 5>}, {pipeline_mode = #tpu.pipeline_mode<synchronous>, transform_indices = @transform_6, window_bounds = array<i64: 10, 1>}, {pipeline_mode = #tpu.pipeline_mode<synchronous>, transform_indices = @transform_7, window_bounds = array<i64: 2, 10>}, {pipeline_mode = #tpu.pipeline_mode<synchronous>, transform_indices = @transform_8, window_bounds = array<i64: 2, 1>}, {transform_indices = @transform_9, window_bounds = array<i64: 2, 128>}]} {
    %c0 = arith.constant 0 : index
    %c0_0 = arith.constant 0 : index
    %0 = vector.load %arg1[%c0, %c0_0] : memref<2x128xf32, #tpu.memory_space<vmem>>, vector<2x128xf32>
    %c0_1 = arith.constant 0 : index
    %c0_2 = arith.constant 0 : index
    %1 = vector.load %arg2[%c0_1, %c0_2] : memref<10x2xf32, #tpu.memory_space<vmem>>, vector<10x1xf32>
    %2 = vector.extract_strided_slice %0 {offsets = [0, 0], sizes = [1, 128], strides = [1, 1]} : vector<2x128xf32> to vector<1x128xf32>
    %3 = vector.broadcast %1 : vector<10x1xf32> to vector<10x128xf32>
    %4 = vector.broadcast %2 : vector<1x128xf32> to vector<10x128xf32>
    %5 = arith.mulf %3, %4 : vector<10x128xf32>
    %c0_3 = arith.constant 0 : index
    %c1 = arith.constant 1 : index
    %6 = vector.load %arg2[%c0_3, %c1] : memref<10x2xf32, #tpu.memory_space<vmem>>, vector<10x1xf32>
    %7 = vector.extract_strided_slice %0 {offsets = [1, 0], sizes = [1, 128], strides = [1, 1]} : vector<2x128xf32> to vector<1x128xf32>
    %8 = vector.broadcast %6 : vector<10x1xf32> to vector<10x128xf32>
    %9 = vector.broadcast %7 : vector<1x128xf32> to vector<10x128xf32>
    %10 = arith.mulf %8, %9 : vector<10x128xf32>
    %11 = arith.addf %5, %10 : vector<10x128xf32>
    %c0_4 = arith.constant 0 : index
    %c0_5 = arith.constant 0 : index
    %12 = vector.load %arg3[%c0_4, %c0_5] : memref<10x1xf32, #tpu.memory_space<vmem>>, vector<10x1xf32>
    %13 = vector.broadcast %12 : vector<10x1xf32> to vector<10x128xf32>
    %14 = arith.addf %11, %13 : vector<10x128xf32>
    %cst = arith.constant 0.000000e+00 : f32
    %15 = vector.broadcast %cst : f32 to vector<10x128xf32>
    %16 = arith.maximumf %14, %15 : vector<10x128xf32>
    %c0_6 = arith.constant 0 : index
    %c0_7 = arith.constant 0 : index
    %17 = vector.load %arg4[%c0_6, %c0_7] : memref<5x10xf32, #tpu.memory_space<vmem>>, vector<5x1xf32>
    %18 = vector.extract_strided_slice %16 {offsets = [0, 0], sizes = [1, 128], strides = [1, 1]} : vector<10x128xf32> to vector<1x128xf32>
    %19 = vector.broadcast %17 : vector<5x1xf32> to vector<5x128xf32>
    %20 = vector.broadcast %18 : vector<1x128xf32> to vector<5x128xf32>
    %21 = arith.mulf %19, %20 : vector<5x128xf32>
    %c0_8 = arith.constant 0 : index
    %c1_9 = arith.constant 1 : index
    %22 = vector.load %arg4[%c0_8, %c1_9] : memref<5x10xf32, #tpu.memory_space<vmem>>, vector<5x1xf32>
    %23 = vector.extract_strided_slice %16 {offsets = [1, 0], sizes = [1, 128], strides = [1, 1]} : vector<10x128xf32> to vector<1x128xf32>
    %24 = vector.broadcast %22 : vector<5x1xf32> to vector<5x128xf32>
    %25 = vector.broadcast %23 : vector<1x128xf32> to vector<5x128xf32>
    %26 = arith.mulf %24, %25 : vector<5x128xf32>
    %27 = arith.addf %21, %26 : vector<5x128xf32>
    %c0_10 = arith.constant 0 : index
    %c2 = arith.constant 2 : index
    %28 = vector.load %arg4[%c0_10, %c2] : memref<5x10xf32, #tpu.memory_space<vmem>>, vector<5x1xf32>
    %29 = vector.extract_strided_slice %16 {offsets = [2, 0], sizes = [1, 128], strides = [1, 1]} : vector<10x128xf32> to vector<1x128xf32>
    %30 = vector.broadcast %28 : vector<5x1xf32> to vector<5x128xf32>
    %31 = vector.broadcast %29 : vector<1x128xf32> to vector<5x128xf32>
    %32 = arith.mulf %30, %31 : vector<5x128xf32>
    %33 = arith.addf %27, %32 : vector<5x128xf32>
    %c0_11 = arith.constant 0 : index
    %c3 = arith.constant 3 : index
    %34 = vector.load %arg4[%c0_11, %c3] : memref<5x10xf32, #tpu.memory_space<vmem>>, vector<5x1xf32>
    %35 = vector.extract_strided_slice %16 {offsets = [3, 0], sizes = [1, 128], strides = [1, 1]} : vector<10x128xf32> to vector<1x128xf32>
    %36 = vector.broadcast %34 : vector<5x1xf32> to vector<5x128xf32>
    %37 = vector.broadcast %35 : vector<1x128xf32> to vector<5x128xf32>
    %38 = arith.mulf %36, %37 : vector<5x128xf32>
    %39 = arith.addf %33, %38 : vector<5x128xf32>
    %c0_12 = arith.constant 0 : index
    %c4 = arith.constant 4 : index
    %40 = vector.load %arg4[%c0_12, %c4] : memref<5x10xf32, #tpu.memory_space<vmem>>, vector<5x1xf32>
    %41 = vector.extract_strided_slice %16 {offsets = [4, 0], sizes = [1, 128], strides = [1, 1]} : vector<10x128xf32> to vector<1x128xf32>
    %42 = vector.broadcast %40 : vector<5x1xf32> to vector<5x128xf32>
    %43 = vector.broadcast %41 : vector<1x128xf32> to vector<5x128xf32>
    %44 = arith.mulf %42, %43 : vector<5x128xf32>
    %45 = arith.addf %39, %44 : vector<5x128xf32>
    %c0_13 = arith.constant 0 : index
    %c5 = arith.constant 5 : index
    %46 = vector.load %arg4[%c0_13, %c5] : memref<5x10xf32, #tpu.memory_space<vmem>>, vector<5x1xf32>
    %47 = vector.extract_strided_slice %16 {offsets = [5, 0], sizes = [1, 128], strides = [1, 1]} : vector<10x128xf32> to vector<1x128xf32>
    %48 = vector.broadcast %46 : vector<5x1xf32> to vector<5x128xf32>
    %49 = vector.broadcast %47 : vector<1x128xf32> to vector<5x128xf32>
    %50 = arith.mulf %48, %49 : vector<5x128xf32>
    %51 = arith.addf %45, %50 : vector<5x128xf32>
    %c0_14 = arith.constant 0 : index
    %c6 = arith.constant 6 : index
    %52 = vector.load %arg4[%c0_14, %c6] : memref<5x10xf32, #tpu.memory_space<vmem>>, vector<5x1xf32>
    %53 = vector.extract_strided_slice %16 {offsets = [6, 0], sizes = [1, 128], strides = [1, 1]} : vector<10x128xf32> to vector<1x128xf32>
    %54 = vector.broadcast %52 : vector<5x1xf32> to vector<5x128xf32>
    %55 = vector.broadcast %53 : vector<1x128xf32> to vector<5x128xf32>
    %56 = arith.mulf %54, %55 : vector<5x128xf32>
    %57 = arith.addf %51, %56 : vector<5x128xf32>
    %c0_15 = arith.constant 0 : index
    %c7 = arith.constant 7 : index
    %58 = vector.load %arg4[%c0_15, %c7] : memref<5x10xf32, #tpu.memory_space<vmem>>, vector<5x1xf32>
    %59 = vector.extract_strided_slice %16 {offsets = [7, 0], sizes = [1, 128], strides = [1, 1]} : vector<10x128xf32> to vector<1x128xf32>
    %60 = vector.broadcast %58 : vector<5x1xf32> to vector<5x128xf32>
    %61 = vector.broadcast %59 : vector<1x128xf32> to vector<5x128xf32>
    %62 = arith.mulf %60, %61 : vector<5x128xf32>
    %63 = arith.addf %57, %62 : vector<5x128xf32>
    %c0_16 = arith.constant 0 : index
    %c8 = arith.constant 8 : index
    %64 = vector.load %arg4[%c0_16, %c8] : memref<5x10xf32, #tpu.memory_space<vmem>>, vector<5x1xf32>
    %65 = vector.extract_strided_slice %16 {offsets = [8, 0], sizes = [1, 128], strides = [1, 1]} : vector<10x128xf32> to vector<1x128xf32>
    %66 = vector.broadcast %64 : vector<5x1xf32> to vector<5x128xf32>
    %67 = vector.broadcast %65 : vector<1x128xf32> to vector<5x128xf32>
    %68 = arith.mulf %66, %67 : vector<5x128xf32>
    %69 = arith.addf %63, %68 : vector<5x128xf32>
    %c0_17 = arith.constant 0 : index
    %c9 = arith.constant 9 : index
    %70 = vector.load %arg4[%c0_17, %c9] : memref<5x10xf32, #tpu.memory_space<vmem>>, vector<5x1xf32>
    %71 = vector.extract_strided_slice %16 {offsets = [9, 0], sizes = [1, 128], strides = [1, 1]} : vector<10x128xf32> to vector<1x128xf32>
    %72 = vector.broadcast %70 : vector<5x1xf32> to vector<5x128xf32>
    %73 = vector.broadcast %71 : vector<1x128xf32> to vector<5x128xf32>
    %74 = arith.mulf %72, %73 : vector<5x128xf32>
    %75 = arith.addf %69, %74 : vector<5x128xf32>
    %c0_18 = arith.constant 0 : index
    %c0_19 = arith.constant 0 : index
    %76 = vector.load %arg5[%c0_18, %c0_19] : memref<5x1xf32, #tpu.memory_space<vmem>>, vector<5x1xf32>
    %77 = vector.broadcast %76 : vector<5x1xf32> to vector<5x128xf32>
    %78 = arith.addf %75, %77 : vector<5x128xf32>
    %c0_20 = arith.constant 0 : index
    %c0_21 = arith.constant 0 : index
    %79 = vector.load %arg6[%c0_20, %c0_21] : memref<10x5xf32, #tpu.memory_space<vmem>>, vector<10x1xf32>
    %80 = vector.extract_strided_slice %78 {offsets = [0, 0], sizes = [1, 128], strides = [1, 1]} : vector<5x128xf32> to vector<1x128xf32>
    %81 = vector.broadcast %79 : vector<10x1xf32> to vector<10x128xf32>
    %82 = vector.broadcast %80 : vector<1x128xf32> to vector<10x128xf32>
    %83 = arith.mulf %81, %82 : vector<10x128xf32>
    %c0_22 = arith.constant 0 : index
    %c1_23 = arith.constant 1 : index
    %84 = vector.load %arg6[%c0_22, %c1_23] : memref<10x5xf32, #tpu.memory_space<vmem>>, vector<10x1xf32>
    %85 = vector.extract_strided_slice %78 {offsets = [1, 0], sizes = [1, 128], strides = [1, 1]} : vector<5x128xf32> to vector<1x128xf32>
    %86 = vector.broadcast %84 : vector<10x1xf32> to vector<10x128xf32>
    %87 = vector.broadcast %85 : vector<1x128xf32> to vector<10x128xf32>
    %88 = arith.mulf %86, %87 : vector<10x128xf32>
    %89 = arith.addf %83, %88 : vector<10x128xf32>
    %c0_24 = arith.constant 0 : index
    %c2_25 = arith.constant 2 : index
    %90 = vector.load %arg6[%c0_24, %c2_25] : memref<10x5xf32, #tpu.memory_space<vmem>>, vector<10x1xf32>
    %91 = vector.extract_strided_slice %78 {offsets = [2, 0], sizes = [1, 128], strides = [1, 1]} : vector<5x128xf32> to vector<1x128xf32>
    %92 = vector.broadcast %90 : vector<10x1xf32> to vector<10x128xf32>
    %93 = vector.broadcast %91 : vector<1x128xf32> to vector<10x128xf32>
    %94 = arith.mulf %92, %93 : vector<10x128xf32>
    %95 = arith.addf %89, %94 : vector<10x128xf32>
    %c0_26 = arith.constant 0 : index
    %c3_27 = arith.constant 3 : index
    %96 = vector.load %arg6[%c0_26, %c3_27] : memref<10x5xf32, #tpu.memory_space<vmem>>, vector<10x1xf32>
    %97 = vector.extract_strided_slice %78 {offsets = [3, 0], sizes = [1, 128], strides = [1, 1]} : vector<5x128xf32> to vector<1x128xf32>
    %98 = vector.broadcast %96 : vector<10x1xf32> to vector<10x128xf32>
    %99 = vector.broadcast %97 : vector<1x128xf32> to vector<10x128xf32>
    %100 = arith.mulf %98, %99 : vector<10x128xf32>
    %101 = arith.addf %95, %100 : vector<10x128xf32>
    %c0_28 = arith.constant 0 : index
    %c4_29 = arith.constant 4 : index
    %102 = vector.load %arg6[%c0_28, %c4_29] : memref<10x5xf32, #tpu.memory_space<vmem>>, vector<10x1xf32>
    %103 = vector.extract_strided_slice %78 {offsets = [4, 0], sizes = [1, 128], strides = [1, 1]} : vector<5x128xf32> to vector<1x128xf32>
    %104 = vector.broadcast %102 : vector<10x1xf32> to vector<10x128xf32>
    %105 = vector.broadcast %103 : vector<1x128xf32> to vector<10x128xf32>
    %106 = arith.mulf %104, %105 : vector<10x128xf32>
    %107 = arith.addf %101, %106 : vector<10x128xf32>
    %c0_30 = arith.constant 0 : index
    %c0_31 = arith.constant 0 : index
    %108 = vector.load %arg7[%c0_30, %c0_31] : memref<10x1xf32, #tpu.memory_space<vmem>>, vector<10x1xf32>
    %109 = vector.broadcast %108 : vector<10x1xf32> to vector<10x128xf32>
    %110 = arith.addf %107, %109 : vector<10x128xf32>
    %cst_32 = arith.constant 0.000000e+00 : f32
    %111 = vector.broadcast %cst_32 : f32 to vector<10x128xf32>
    %112 = arith.maximumf %110, %111 : vector<10x128xf32>
    %c0_33 = arith.constant 0 : index
    %c0_34 = arith.constant 0 : index
    %113 = vector.load %arg8[%c0_33, %c0_34] : memref<2x10xf32, #tpu.memory_space<vmem>>, vector<2x1xf32>
    %114 = vector.extract_strided_slice %112 {offsets = [0, 0], sizes = [1, 128], strides = [1, 1]} : vector<10x128xf32> to vector<1x128xf32>
    %115 = vector.broadcast %113 : vector<2x1xf32> to vector<2x128xf32>
    %116 = vector.broadcast %114 : vector<1x128xf32> to vector<2x128xf32>
    %117 = arith.mulf %115, %116 : vector<2x128xf32>
    %c0_35 = arith.constant 0 : index
    %c1_36 = arith.constant 1 : index
    %118 = vector.load %arg8[%c0_35, %c1_36] : memref<2x10xf32, #tpu.memory_space<vmem>>, vector<2x1xf32>
    %119 = vector.extract_strided_slice %112 {offsets = [1, 0], sizes = [1, 128], strides = [1, 1]} : vector<10x128xf32> to vector<1x128xf32>
    %120 = vector.broadcast %118 : vector<2x1xf32> to vector<2x128xf32>
    %121 = vector.broadcast %119 : vector<1x128xf32> to vector<2x128xf32>
    %122 = arith.mulf %120, %121 : vector<2x128xf32>
    %123 = arith.addf %117, %122 : vector<2x128xf32>
    %c0_37 = arith.constant 0 : index
    %c2_38 = arith.constant 2 : index
    %124 = vector.load %arg8[%c0_37, %c2_38] : memref<2x10xf32, #tpu.memory_space<vmem>>, vector<2x1xf32>
    %125 = vector.extract_strided_slice %112 {offsets = [2, 0], sizes = [1, 128], strides = [1, 1]} : vector<10x128xf32> to vector<1x128xf32>
    %126 = vector.broadcast %124 : vector<2x1xf32> to vector<2x128xf32>
    %127 = vector.broadcast %125 : vector<1x128xf32> to vector<2x128xf32>
    %128 = arith.mulf %126, %127 : vector<2x128xf32>
    %129 = arith.addf %123, %128 : vector<2x128xf32>
    %c0_39 = arith.constant 0 : index
    %c3_40 = arith.constant 3 : index
    %130 = vector.load %arg8[%c0_39, %c3_40] : memref<2x10xf32, #tpu.memory_space<vmem>>, vector<2x1xf32>
    %131 = vector.extract_strided_slice %112 {offsets = [3, 0], sizes = [1, 128], strides = [1, 1]} : vector<10x128xf32> to vector<1x128xf32>
    %132 = vector.broadcast %130 : vector<2x1xf32> to vector<2x128xf32>
    %133 = vector.broadcast %131 : vector<1x128xf32> to vector<2x128xf32>
    %134 = arith.mulf %132, %133 : vector<2x128xf32>
    %135 = arith.addf %129, %134 : vector<2x128xf32>
    %c0_41 = arith.constant 0 : index
    %c4_42 = arith.constant 4 : index
    %136 = vector.load %arg8[%c0_41, %c4_42] : memref<2x10xf32, #tpu.memory_space<vmem>>, vector<2x1xf32>
    %137 = vector.extract_strided_slice %112 {offsets = [4, 0], sizes = [1, 128], strides = [1, 1]} : vector<10x128xf32> to vector<1x128xf32>
    %138 = vector.broadcast %136 : vector<2x1xf32> to vector<2x128xf32>
    %139 = vector.broadcast %137 : vector<1x128xf32> to vector<2x128xf32>
    %140 = arith.mulf %138, %139 : vector<2x128xf32>
    %141 = arith.addf %135, %140 : vector<2x128xf32>
    %c0_43 = arith.constant 0 : index
    %c5_44 = arith.constant 5 : index
    %142 = vector.load %arg8[%c0_43, %c5_44] : memref<2x10xf32, #tpu.memory_space<vmem>>, vector<2x1xf32>
    %143 = vector.extract_strided_slice %112 {offsets = [5, 0], sizes = [1, 128], strides = [1, 1]} : vector<10x128xf32> to vector<1x128xf32>
    %144 = vector.broadcast %142 : vector<2x1xf32> to vector<2x128xf32>
    %145 = vector.broadcast %143 : vector<1x128xf32> to vector<2x128xf32>
    %146 = arith.mulf %144, %145 : vector<2x128xf32>
    %147 = arith.addf %141, %146 : vector<2x128xf32>
    %c0_45 = arith.constant 0 : index
    %c6_46 = arith.constant 6 : index
    %148 = vector.load %arg8[%c0_45, %c6_46] : memref<2x10xf32, #tpu.memory_space<vmem>>, vector<2x1xf32>
    %149 = vector.extract_strided_slice %112 {offsets = [6, 0], sizes = [1, 128], strides = [1, 1]} : vector<10x128xf32> to vector<1x128xf32>
    %150 = vector.broadcast %148 : vector<2x1xf32> to vector<2x128xf32>
    %151 = vector.broadcast %149 : vector<1x128xf32> to vector<2x128xf32>
    %152 = arith.mulf %150, %151 : vector<2x128xf32>
    %153 = arith.addf %147, %152 : vector<2x128xf32>
    %c0_47 = arith.constant 0 : index
    %c7_48 = arith.constant 7 : index
    %154 = vector.load %arg8[%c0_47, %c7_48] : memref<2x10xf32, #tpu.memory_space<vmem>>, vector<2x1xf32>
    %155 = vector.extract_strided_slice %112 {offsets = [7, 0], sizes = [1, 128], strides = [1, 1]} : vector<10x128xf32> to vector<1x128xf32>
    %156 = vector.broadcast %154 : vector<2x1xf32> to vector<2x128xf32>
    %157 = vector.broadcast %155 : vector<1x128xf32> to vector<2x128xf32>
    %158 = arith.mulf %156, %157 : vector<2x128xf32>
    %159 = arith.addf %153, %158 : vector<2x128xf32>
    %c0_49 = arith.constant 0 : index
    %c8_50 = arith.constant 8 : index
    %160 = vector.load %arg8[%c0_49, %c8_50] : memref<2x10xf32, #tpu.memory_space<vmem>>, vector<2x1xf32>
    %161 = vector.extract_strided_slice %112 {offsets = [8, 0], sizes = [1, 128], strides = [1, 1]} : vector<10x128xf32> to vector<1x128xf32>
    %162 = vector.broadcast %160 : vector<2x1xf32> to vector<2x128xf32>
    %163 = vector.broadcast %161 : vector<1x128xf32> to vector<2x128xf32>
    %164 = arith.mulf %162, %163 : vector<2x128xf32>
    %165 = arith.addf %159, %164 : vector<2x128xf32>
    %c0_51 = arith.constant 0 : index
    %c9_52 = arith.constant 9 : index
    %166 = vector.load %arg8[%c0_51, %c9_52] : memref<2x10xf32, #tpu.memory_space<vmem>>, vector<2x1xf32>
    %167 = vector.extract_strided_slice %112 {offsets = [9, 0], sizes = [1, 128], strides = [1, 1]} : vector<10x128xf32> to vector<1x128xf32>
    %168 = vector.broadcast %166 : vector<2x1xf32> to vector<2x128xf32>
    %169 = vector.broadcast %167 : vector<1x128xf32> to vector<2x128xf32>
    %170 = arith.mulf %168, %169 : vector<2x128xf32>
    %171 = arith.addf %165, %170 : vector<2x128xf32>
    %c0_53 = arith.constant 0 : index
    %c0_54 = arith.constant 0 : index
    %172 = vector.load %arg9[%c0_53, %c0_54] : memref<2x1xf32, #tpu.memory_space<vmem>>, vector<2x1xf32>
    %173 = vector.broadcast %172 : vector<2x1xf32> to vector<2x128xf32>
    %174 = arith.addf %171, %173 : vector<2x128xf32>
    %c0_55 = arith.constant 0 : index
    %c0_56 = arith.constant 0 : index
    %175 = vector.load %arg10[%c0_55, %c0_56] : memref<2x128xf32, #tpu.memory_space<vmem>>, vector<2x128xf32>
    tpu.vector_store %arg10[%c0_55, %c0_56], %174 {strides = array<i32>} : memref<2x128xf32, #tpu.memory_space<vmem>>, vector<2x128xf32>,
    return
  }
  func.func @transform_0(%arg0: i32) -> (i32, i32) {
    %c0_i32 = arith.constant 0 : i32
    %c0_i32_0 = arith.constant 0 : i32
    return %c0_i32, %arg0 : i32, i32
  }
  func.func @transform_1(%arg0: i32) -> (i32, i32) {
    %c0_i32 = arith.constant 0 : i32
    %c0_i32_0 = arith.constant 0 : i32
    %c0_i32_1 = arith.constant 0 : i32
    return %c0_i32, %c0_i32_0 : i32, i32
  }
  func.func @transform_2(%arg0: i32) -> (i32, i32) {
    %c0_i32 = arith.constant 0 : i32
    %c0_i32_0 = arith.constant 0 : i32
    %c0_i32_1 = arith.constant 0 : i32
    return %c0_i32, %c0_i32_0 : i32, i32
  }
  func.func @transform_3(%arg0: i32) -> (i32, i32) {
    %c0_i32 = arith.constant 0 : i32
    %c0_i32_0 = arith.constant 0 : i32
    %c0_i32_1 = arith.constant 0 : i32
    return %c0_i32, %c0_i32_0 : i32, i32
  }
  func.func @transform_4(%arg0: i32) -> (i32, i32) {
    %c0_i32 = arith.constant 0 : i32
    %c0_i32_0 = arith.constant 0 : i32
    %c0_i32_1 = arith.constant 0 : i32
    return %c0_i32, %c0_i32_0 : i32, i32
  }
  func.func @transform_5(%arg0: i32) -> (i32, i32) {
    %c0_i32 = arith.constant 0 : i32
    %c0_i32_0 = arith.constant 0 : i32
    %c0_i32_1 = arith.constant 0 : i32
    return %c0_i32, %c0_i32_0 : i32, i32
  }
  func.func @transform_6(%arg0: i32) -> (i32, i32) {
    %c0_i32 = arith.constant 0 : i32
    %c0_i32_0 = arith.constant 0 : i32
    %c0_i32_1 = arith.constant 0 : i32
    return %c0_i32, %c0_i32_0 : i32, i32
  }
  func.func @transform_7(%arg0: i32) -> (i32, i32) {
    %c0_i32 = arith.constant 0 : i32
    %c0_i32_0 = arith.constant 0 : i32
    %c0_i32_1 = arith.constant 0 : i32
    return %c0_i32, %c0_i32_0 : i32, i32
  }
  func.func @transform_8(%arg0: i32) -> (i32, i32) {
    %c0_i32 = arith.constant 0 : i32
    %c0_i32_0 = arith.constant 0 : i32
    %c0_i32_1 = arith.constant 0 : i32
    return %c0_i32, %c0_i32_0 : i32, i32
  }
  func.func @transform_9(%arg0: i32) -> (i32, i32) {
    %c0_i32 = arith.constant 0 : i32
    %c0_i32_0 = arith.constant 0 : i32
    return %c0_i32, %arg0 : i32, i32
  }
}

</mosaic_0001>

<bundles_post_ra>
// kernel: tpu_custom_call.1
= control target key start
LH: loop header
LB: loop body
LE: loop exit
PB: predicated region body
PF: predicated region fallthrough
CT: control target
= control target key end

     0   :  { %v479_v1 = vmov 1   ;;  %v480_v2 = vmov 0   ;;  %s656_s0 = inlined_call_operand.vmem [shape: f32[2,128], index: 0, kind: input, shape index: {}]   ;;  %s657_s1 = inlined_call_operand.vmem [shape: f32[10,2], index: 1, kind: input, shape index: {}]   ;;  %s658_s2 = inlined_call_operand.vmem [shape: f32[10,1], index: 2, kind: input, shape index: {}]   ;;  %s659_s3 = inlined_call_operand.vmem [shape: f32[5,10], index: 3, kind: input, shape index: {}]   ;;  %s660_s4 = inlined_call_operand.vmem [shape: f32[5,1], index: 4, kind: input, shape index: {}]   ;;  %s661_s5 = inlined_call_operand.vmem [shape: f32[10,5], index: 5, kind: input, shape index: {}]   ;;  %s662_s6 = inlined_call_operand.vmem [shape: f32[10,1], index: 6, kind: input, shape index: {}]   ;;  %s663_s7 = inlined_call_operand.vmem [shape: f32[2,10], index: 7, kind: input, shape index: {}]   ;;  %s664_s8 = inlined_call_operand.vmem [shape: f32[2,1], index: 8, kind: input, shape index: {}]   ;;  %s665_s9 = inlined_call_operand.hbm [shape: f32[2,128], index: 9, kind: output, shape index: {}]  }
   0x1   :  { %v34_v0 = vld [vmem:[%s657_s1] sm:$0xff]  ;;  %425 = vset.pattern.permute.xlu1 %v479_v1  ;;  %424 = vset.pattern.permute.xlu0 %v480_v2  ;;  %v35_v3 = vld [vmem:[%s657_s1 + $0x8] sm:$0x3] }
   0x2   :  { %53 = vperm.xlu1 %425, %v34_v0   ;;  %38 = vperm.xlu0 %424, %v34_v0  }
   0x3   :  { %14 = vsyncpa [#allocation3], 0  ;;  %v68_v4 = vld [vmem:[%s658_s2] sm:$0xff]  ;;  %v69_v5 = vld [vmem:[%s658_s2 + $0x8] sm:$0x3]  ;;  %v481_v7 = vmov 2   ;;  %v46_v22 = vlaneseq }
   0x4   :  { %v84_v6 = vld [vmem:[%s659_s3] sm:$0x1f]  ;;  %v482_v8 = vmov 3   ;;  %v483_v9 = vmov 5   ;;  %v484_v10 = vmov 4   ;;  %v485_v11 = vmov 8  }
   0x5   :  { %v486_v12 = vmov 6   ;;  %v192_v13 = vld [vmem:[%s661_s5] sm:$0xff]  ;;  %v487_v14 = vmov 7   ;;  %v488_v15 = vmov 9   ;;  %v193_v16 = vld [vmem:[%s661_s5 + $0x8] sm:$0x3] }
   0x6   :  { %57 = vperm.xlu1 %425, %v35_v3   ;;  %43 = vperm.xlu0 %424, %v35_v3   ;;  %v185_v17 = vld [vmem:[%s660_s4] sm:$0x1f]  ;;  %v275_v19 = vld [vmem:[%s662_s6 + $0x8] sm:$0x3]  ;;  %v588_v23 = vshrl.u32 %v46_v22, 7 }
   0x7   :  { %v290_v18 = vld [vmem:[%s663_s7] sm:$0x3] }
   0x8   :  { %v274_v20 = vld [vmem:[%s662_s6] sm:$0xff]  ;;  %v591_v24 = vsub.s32 1, %v588_v23  ;;  %v594_v25 = vsub.s32 0, %v588_v23  ;;  %v604_v44 = vsub.s32 2, %v588_v23  ;;  %v608_v50 = vsub.s32 3, %v588_v23 }
   0x9   :  { %v391_v21 = vld [vmem:[%s664_s8] sm:$0x3]  ;;  %v611_v53 = vsub.s32 4, %v588_v23  ;;  %v141_v61 = vsub.s32 5, %v588_v23 }
   0xa   :  { %426 = vset.pattern.permute.xlu1 %v480_v2  ;;  %72 = vperm.xlu0 %424, %v68_v4   ;;  %v33_v26 = vld [vmem:[%s656_s0] sm:$0x3]  ;;  %s489_s0 = smov [#allocation2]  }
   0xb   :  { %77 = vperm.xlu1 %426, %v69_v5   ;;  %v63_v27 = vrot.slane %v33_v26, %v591_v24  ;;  %v49_v28 = vrot.slane %v33_v26, %v594_v25  ;;  %s405_s27 = sshll.u32 %s489_s0, 4  ;;  %s406_s27 = int_to_ptr.vmem [resolvable:$true] %s405_s27 }
   0xc   :  { %s455_s28 = scalar_lea.vmem %s406_s27, 32  ;;  %p460_p1 = scmp.lt.s32.totalorder %s406_s27, %s406_s27 }
   0xd   :  { %p456_p0 = scmp.ne.s32.totalorder %s406_s27, %s455_s28  ;;  %p461_p2 = scmp.lt.s32.totalorder %s455_s28, %s455_s28 }
   0xe   :  { %87 = vperm.xlu0 %424, %v84_v6  }
   0xf   :  { %427 = vset.pattern.permute.xlu1 %v479_v1  ;;  %p462_p3 = por %p461_p2, %p460_p1 }
  0x10   :  { %96 = vperm.xlu1 %427, %v84_v6  }
  0x11   :  { %p463_p4 = pnand %p462_p3, %p456_p0 }
  0x12   :  { %428 = vset.pattern.permute.xlu0 %v481_v7 }
  0x13   :  { %106 = vperm.xlu0 %428, %v84_v6  }
  0x14   :  { %429 = vset.pattern.permute.xlu1 %v482_v8 }
  0x15   :  { %116 = vperm.xlu1 %429, %v84_v6  }
  0x17   :  { %431 = vset.pattern.permute.xlu0 %v483_v9 }
  0x18   :  { %136 = vperm.xlu0 %431, %v84_v6  }
  0x19   :  { %430 = vset.pattern.permute.xlu1 %v484_v10 }
  0x1a   :  { %126 = vperm.xlu1 %430, %v84_v6  }
  0x1c   :  { %434 = vset.pattern.permute.xlu0 %v485_v11 }
  0x1d   :  { %166 = vperm.xlu0 %434, %v84_v6  }
  0x1e   :  { %432 = vset.pattern.permute.xlu1 %v486_v12 }
  0x1f   :  { %146 = vperm.xlu1 %432, %v84_v6  }
  0x21   :  { %437 = vset.pattern.permute.xlu0 %v480_v2 }
  0x22   :  { %196 = vperm.xlu0 %437, %v192_v13  }
  0x23   :  { %433 = vset.pattern.permute.xlu1 %v487_v14 }
  0x24   :  { %156 = vperm.xlu1 %433, %v84_v6  }
  0x26   :  { %440 = vset.pattern.permute.xlu0 %v482_v8 }
  0x27   :  { %243 = vperm.xlu0 %440, %v192_v13  }
  0x28   :  { %435 = vset.pattern.permute.xlu1 %v488_v15 }
  0x29   :  { %176 = vperm.xlu1 %435, %v84_v6   ;;  %v161_v6 = vsub.s32 7, %v588_v23 }
  0x2b   :  { %247 = vperm.xlu0 %440, %v193_v16  }
  0x2d   :  { %436 = vset.pattern.permute.xlu1 %v480_v2 }
  0x2e   :  { %188 = vperm.xlu1 %436, %v185_v17  }
  0x2f   :  { %322 = vperm.xlu0 %440, %v290_v18  }
  0x32   :  { %438 = vset.pattern.permute.xlu1 %v479_v1 }
  0x33   :  { %211 = vperm.xlu1 %438, %v192_v13   ;;  %448 = vset.pattern.permute.xlu0 %v480_v2 }
  0x34   :  { %201 = vperm.xlu0 %448, %v193_v16  }
  0x37   :  { %439 = vset.pattern.permute.xlu1 %v481_v7 }
  0x38   :  { %227 = vperm.xlu1 %439, %v192_v13   ;;  %293 = vperm.xlu0 %448, %v290_v18  }
  0x3c   :  { %441 = vset.pattern.permute.xlu1 %v484_v10  ;;  %283 = vperm.xlu0 %448, %v275_v19  }
  0x3d   :  { %259 = vperm.xlu1 %441, %v192_v13  }
  0x40   :  { %451 = vset.pattern.permute.xlu0 %v487_v14 }
  0x41   :  { %442 = vset.pattern.permute.xlu1 %v480_v2  ;;  %362 = vperm.xlu0 %451, %v290_v18  }
  0x42   :  { %278 = vperm.xlu1 %442, %v274_v20  }
  0x45   :  { %454 = vset.pattern.permute.xlu0 %v480_v2  ;;  %v151_v2 = vsub.s32 6, %v588_v23 }
  0x46   :  { %443 = vset.pattern.permute.xlu1 %v479_v1  ;;  %394 = vperm.xlu0 %454, %v391_v21  }
  0x47   :  { %215 = vperm.xlu1 %443, %v193_v16  }
  0x4b   :  { %444 = vset.pattern.permute.xlu1 %v481_v7 }
  0x4c   :  { %231 = vperm.xlu1 %444, %v193_v16  }
  0x50   :  { %445 = vset.pattern.permute.xlu1 %v479_v1 }
  0x51   :  { %302 = vperm.xlu1 %445, %v290_v18  }
  0x55   :  { %446 = vset.pattern.permute.xlu1 %v481_v7 }
  0x56   :  { %312 = vperm.xlu1 %446, %v290_v18  }
  0x5a   :  { %447 = vset.pattern.permute.xlu1 %v484_v10 }
  0x5b   :  { %263 = vperm.xlu1 %447, %v193_v16  }
  0x5f   :  { %332 = vperm.xlu1 %447, %v290_v18  }
  0x63   :  { %449 = vset.pattern.permute.xlu1 %v483_v9 }
  0x64   :  { %342 = vperm.xlu1 %449, %v290_v18  }
  0x68   :  { %450 = vset.pattern.permute.xlu1 %v486_v12 }
  0x69   :  { %352 = vperm.xlu1 %450, %v290_v18  }
  0x6d   :  { %452 = vset.pattern.permute.xlu1 %v485_v11 }
  0x6e   :  { %372 = vperm.xlu1 %452, %v290_v18  }
  0x72   :  { %453 = vset.pattern.permute.xlu1 %v488_v15 }
  0x73   :  { %382 = vperm.xlu1 %453, %v290_v18  }
  0x81   :  { %v54_v29 = vpop.permute.xlu1 %53  ;;  %v39_v30 = vpop.permute.xlu0 %38 }
  0x82   :  { %v64_v31 = vmul.f32 %v63_v27, %v54_v29  ;;  %v50_v32 = vmul.f32 %v49_v28, %v39_v30 }
  0x84   :  { %v66_v35 = vadd.f32 %v64_v31, %v50_v32 }
  0x85   :  { %v58_v33 = vpop.permute.xlu1 %57  ;;  %v44_v34 = vpop.permute.xlu0 %43 }
  0x86   :  { %v65_v56 = vmul.f32 %v63_v27, %v58_v33  ;;  %v51_v57 = vmul.f32 %v49_v28, %v44_v34 }
  0x88   :  { %v67_v0 = vadd.f32 %v65_v56, %v51_v57 }
  0x89   :  { %v73_v36 = vpop.permute.xlu0 %72 }
  0x8a   :  { %v80_v37 = vadd.f32 %v73_v36, %v66_v35  ;;  %v78_v38 = vpop.permute.xlu1 %77 }
  0x8b   :  { %v81_v7 = vadd.f32 %v78_v38, %v67_v0 }
  0x8c   :  { %v82_v39 = vmax.f32 %v80_v37, 0.0 }
  0x8d   :  { %v88_v40 = vpop.permute.xlu0 %87  ;;  %v83_v14 = vmax.f32 %v81_v7, 0.0 }
  0x8e   :  { %v93_v41 = vrot.slane %v82_v39, %v594_v25  ;;  %v102_v43 = vrot.slane %v82_v39, %v591_v24  ;;  %v112_v49 = vrot.slane %v82_v39, %v604_v44  ;;  %v122_v54 = vrot.slane %v82_v39, %v608_v50 }
  0x8f   :  { %v97_v42 = vpop.permute.xlu1 %96  ;;  %v132_v60 = vrot.slane %v82_v39, %v611_v53  ;;  %v142_v4 = vrot.slane %v82_v39, %v141_v61  ;;  %v152_v9 = vrot.slane %v82_v39, %v151_v2  ;;  %v162_v13 = vrot.slane %v82_v39, %v161_v6 }
  0x90   :  { %v94_v45 = vmul.f32 %v93_v41, %v88_v40  ;;  %v103_v46 = vmul.f32 %v102_v43, %v97_v42  ;;  %v172_v19 = vrot.slane %v83_v14, %v594_v25  ;;  %v182_v22 = vrot.slane %v83_v14, %v591_v24 }
  0x92   :  { %v107_v47 = vpop.permute.xlu0 %106  ;;  %v104_v51 = vadd.f32 %v103_v46, %v94_v45 }
  0x93   :  { %v113_v52 = vmul.f32 %v112_v49, %v107_v47 }
  0x94   :  { %v117_v48 = vpop.permute.xlu1 %116 }
  0x95   :  { %v114_v58 = vadd.f32 %v113_v52, %v104_v51  ;;  %v123_v59 = vmul.f32 %v122_v54, %v117_v48 }
  0x97   :  { %v124_v1 = vadd.f32 %v123_v59, %v114_v58  ;;  %v137_v3 = vpop.permute.xlu0 %136 }
  0x98   :  { %v143_v8 = vmul.f32 %v142_v4, %v137_v3 }
  0x99   :  { %v127_v55 = vpop.permute.xlu1 %126 }
  0x9a   :  { %v133_v62 = vmul.f32 %v132_v60, %v127_v55 }
  0x9c   :  { %v134_v5 = vadd.f32 %v133_v62, %v124_v1  ;;  %v167_v18 = vpop.permute.xlu0 %166 }
  0x9d   :  { %v173_v21 = vmul.f32 %v172_v19, %v167_v18 }
  0x9e   :  { %v147_v63 = vpop.permute.xlu1 %146  ;;  %v144_v11 = vadd.f32 %v143_v8, %v134_v5 }
  0x9f   :  { %v153_v12 = vmul.f32 %v152_v9, %v147_v63 }
  0xa1   :  { %v154_v17 = vadd.f32 %v153_v12, %v144_v11  ;;  %v197_v35 = vpop.permute.xlu0 %196 }
  0xa3   :  { %v157_v10 = vpop.permute.xlu1 %156 }
  0xa4   :  { %v163_v15 = vmul.f32 %v162_v13, %v157_v10 }
  0xa6   :  { %v164_v20 = vadd.f32 %v163_v15, %v154_v17  ;;  %v244_v42 = vpop.permute.xlu0 %243 }
  0xa8   :  { %v177_v16 = vpop.permute.xlu1 %176  ;;  %v174_v27 = vadd.f32 %v173_v21, %v164_v20 }
  0xa9   :  { %v183_v28 = vmul.f32 %v182_v22, %v177_v16 }
  0xaa   :  { %v248_v51 = vpop.permute.xlu0 %247 }
  0xab   :  { %v184_v30 = vadd.f32 %v183_v28, %v174_v27 }
  0xad   :  { %v189_v26 = vpop.permute.xlu1 %188 }
  0xae   :  { %v191_v31 = vadd.f32 %v189_v26, %v184_v30  ;;  %v323_v57 = vpop.permute.xlu0 %322 }
  0xb0   :  { %v207_v33 = vrot.slane %v191_v31, %v594_v25  ;;  %v221_v34 = vrot.slane %v191_v31, %v591_v24  ;;  %v237_v39 = vrot.slane %v191_v31, %v604_v44  ;;  %v253_v45 = vrot.slane %v191_v31, %v608_v50 }
  0xb1   :  { %v269_v48 = vrot.slane %v191_v31, %v611_v53 }
  0xb2   :  { %v212_v29 = vpop.permute.xlu1 %211  ;;  %v208_v37 = vmul.f32 %v207_v33, %v197_v35  ;;  %v254_v49 = vmul.f32 %v253_v45, %v244_v42  ;;  %v255_v15 = vmul.f32 %v253_v45, %v248_v51 }
  0xb3   :  { %v222_v38 = vmul.f32 %v221_v34, %v212_v29  ;;  %v202_v60 = vpop.permute.xlu0 %201 }
  0xb4   :  { %v209_v1 = vmul.f32 %v207_v33, %v202_v60 }
  0xb5   :  { %v224_v43 = vadd.f32 %v222_v38, %v208_v37 }
  0xb7   :  { %v228_v32 = vpop.permute.xlu1 %227  ;;  %v294_v12 = vpop.permute.xlu0 %293 }
  0xb8   :  { %v238_v40 = vmul.f32 %v237_v39, %v228_v32 }
  0xba   :  { %v240_v46 = vadd.f32 %v238_v40, %v224_v43 }
  0xbb   :  { %v284_v30 = vpop.permute.xlu0 %283 }
  0xbc   :  { %v260_v36 = vpop.permute.xlu1 %259  ;;  %v256_v54 = vadd.f32 %v254_v49, %v240_v46 }
  0xbd   :  { %v270_v52 = vmul.f32 %v269_v48, %v260_v36 }
  0xbf   :  { %v272_v56 = vadd.f32 %v270_v52, %v256_v54 }
  0xc1   :  { %v279_v41 = vpop.permute.xlu1 %278 }
  0xc2   :  { %v286_v59 = vadd.f32 %v279_v41, %v272_v56 }
  0xc4   :  { %v288_v62 = vmax.f32 %v286_v59, 0.0 }
  0xc6   :  { %v216_v47 = vpop.permute.xlu1 %215  ;;  %v299_v5 = vrot.slane %v288_v62, %v594_v25  ;;  %v308_v7 = vrot.slane %v288_v62, %v591_v24  ;;  %v318_v11 = vrot.slane %v288_v62, %v604_v44  ;;  %v328_v20 = vrot.slane %v288_v62, %v608_v50 }
  0xc7   :  { %v223_v63 = vmul.f32 %v221_v34, %v216_v47  ;;  %v338_v26 = vrot.slane %v288_v62, %v611_v53  ;;  %v348_v44 = vrot.slane %v288_v62, %v141_v61  ;;  %v358_v35 = vrot.slane %v288_v62, %v151_v2 }
  0xc8   :  { %v300_v13 = vmul.f32 %v299_v5, %v294_v12  ;;  %v329_v27 = vmul.f32 %v328_v20, %v323_v57  ;;  %v368_v50 = vrot.slane %v288_v62, %v161_v6 }
  0xc9   :  { %v225_v4 = vadd.f32 %v223_v63, %v209_v1 }
  0xcb   :  { %v232_v55 = vpop.permute.xlu1 %231 }
  0xcc   :  { %v239_v3 = vmul.f32 %v237_v39, %v232_v55  ;;  %v363_v39 = vpop.permute.xlu0 %362 }
  0xcd   :  { %v369_v41 = vmul.f32 %v368_v50, %v363_v39 }
  0xce   :  { %v241_v9 = vadd.f32 %v239_v3, %v225_v4 }
  0xd0   :  { %v303_v58 = vpop.permute.xlu1 %302  ;;  %v257_v19 = vadd.f32 %v255_v15, %v241_v9  ;;  %v395_v49 = vpop.permute.xlu0 %394 }
  0xd1   :  { %v309_v10 = vmul.f32 %v308_v7, %v303_v58 }
  0xd3   :  { %v310_v18 = vadd.f32 %v309_v10, %v300_v13 }
  0xd5   :  { %v313_v0 = vpop.permute.xlu1 %312 }
  0xd6   :  { %v319_v14 = vmul.f32 %v318_v11, %v313_v0 }
  0xd8   :  { %v320_v21 = vadd.f32 %v319_v14, %v310_v18 }
  0xda   :  { %v264_v8 = vpop.permute.xlu1 %263  ;;  %v330_v32 = vadd.f32 %v329_v27, %v320_v21 }
  0xdb   :  { %v271_v16 = vmul.f32 %v269_v48, %v264_v8 }
  0xdd   :  { %v273_v22 = vadd.f32 %v271_v16, %v257_v19 }
  0xde   :  { %v333_v17 = vpop.permute.xlu1 %332 }
  0xdf   :  { %v339_v28 = vmul.f32 %v338_v26, %v333_v17  ;;  %v287_v31 = vadd.f32 %v284_v30, %v273_v22 }
  0xe1   :  { %v340_v34 = vadd.f32 %v339_v28, %v330_v32  ;;  %v289_v38 = vmax.f32 %v287_v31, 0.0 }
  0xe3   :  { %v343_v29 = vpop.permute.xlu1 %342  ;;  %v378_v61 = vrot.slane %v289_v38, %v594_v25  ;;  %v388_v46 = vrot.slane %v289_v38, %v591_v24 }
  0xe4   :  { %v349_v33 = vmul.f32 %v348_v44, %v343_v29 }
  0xe6   :  { %v350_v37 = vadd.f32 %v349_v33, %v340_v34 }
  0xe8   :  { %v353_v36 = vpop.permute.xlu1 %352 }
  0xe9   :  { %v359_v53 = vmul.f32 %v358_v35, %v353_v36 }
  0xeb   :  { %v360_v40 = vadd.f32 %v359_v53, %v350_v37 }
  0xed   :  { %v373_v42 = vpop.permute.xlu1 %372  ;;  %v370_v43 = vadd.f32 %v369_v41, %v360_v40 }
  0xee   :  { %v379_v45 = vmul.f32 %v378_v61, %v373_v42 }
  0xf0   :  { %v380_v48 = vadd.f32 %v379_v45, %v370_v43 }
  0xf2   :  { %v383_v47 = vpop.permute.xlu1 %382 }
  0xf3   :  { %v389_v2 = vmul.f32 %v388_v46, %v383_v47 }
  0xf5   :  { %v390_v23 = vadd.f32 %v389_v2, %v380_v48 }
  0xf7   :  { %v397_v6 = vadd.f32 %v395_v49, %v390_v23 }
  0xf9   :  { %398 = vst [vmem:[#allocation2] sm:$0x3] %v397_v6 }
  0xfa   :  { %466 = shalt.err (!%p463_p4)
}
  0xfb   :  { %s467_s10 = scalar_lea.hbm %s665_s9, 32 }
  0xfc   :  { %p468_p5 = scmp.ne.s32.totalorder %s665_s9, %s467_s10  ;;  %p471_p6 = scmp.lt.u32.totalorder %s467_s10, %s665_s9 }
  0xfe   :  { %p473_p7 = pnand %p471_p6, %p468_p5 }
 0x100   :  { %476 = shalt.err (!%p473_p7)
}
 0x101   :  { %408 = dma.vmem_to_hbm [thread:$0]  %s406_s27, 32, %s665_s9, [#allocation3]  }
 0x102   :  { %477 = dma.done.wait [#allocation3], 32  }
 0x103   :  { %478 = vsyncadd [#allocation3], 4294967264 }
 0x104   :  { %412 = vsyncpa [#allocation3], 1 }

</bundles_post_ra>
